<compile_context>
chip_gen: v7x
topology: tpu7x:2x2x1
jax: 0.10.0
libtpu: 0.0.40
codegen_flags: <defaults>
</compile_context>

<pallas_src>
import functools

import jax
import jax.numpy as jnp
from jax.experimental import pallas as pl
from jax.experimental.pallas import tpu as pltpu


def _ce_kernel(x_ref, t_ref, o_ref, acc_ref, *, total_b, tiles_per_part):
    p = pl.program_id(0)          # parallel partition (sharded across TCs on v7x)
    t = pl.program_id(1)          # batch-tile index within the partition (reduction)

    @pl.when(t == 0)
    def _():
        acc_ref[...] = jnp.zeros_like(acc_ref)

    x = x_ref[...]                # (TB, C) in the input dtype
    tgt = t_ref[...]              # (TB, 1) int32
    tb, c = x.shape

    # Global (unclamped) row index.  Duplicate (clamped) tiles past the real
    # block range and garbage rows of the ragged last tile mask to zero here.
    tile_idx = p * tiles_per_part + t
    row = jax.lax.broadcasted_iota(jnp.int32, (tb, 1), 0) + tile_idx * tb
    valid = row < total_b

    # Single shifted operand: max/sub in the input dtype (bf16 VALU on
    # v6e/v7x), one upcast to f32 feeding exp/log/select.
    m = jnp.max(x, axis=-1, keepdims=True)
    xm = (x - m).astype(jnp.float32)                                    # (TB, C) f32

    lse = jnp.log(jnp.sum(jnp.exp(xm), axis=-1, keepdims=True))         # (TB, 1)

    # Targets are dynamic: one-hot compare + lane sum extracts xm[gt].
    cls = jax.lax.broadcasted_iota(jnp.int32, (tb, c), 1)
    tgt_shift = jnp.sum(jnp.where(cls == tgt, xm, 0.0), axis=-1, keepdims=True)

    # per_sample = logsumexp(x) - x[gt] = log(sum(exp(xm))) - xm[gt]
    per_sample = jnp.where(valid, lse - tgt_shift, 0.0)                 # (TB, 1)
    acc_ref[...] += per_sample

    @pl.when(t == pl.num_programs(1) - 1)
    def _():
        # One cross-sublane reduction per partition; broadcast the partial sum
        # into this partition's lane-dense (8,128) output block.
        partial = jnp.sum(acc_ref[...])
        o_ref[...] = jnp.zeros_like(o_ref) + partial


def _vmem_capacity_bytes():
    """Physical VMEM of the current TPU generation (conservative fallback)."""
    try:
        info = pltpu.get_tpu_info()
        cap = int(getattr(info, "vmem_capacity_bytes"))
        if cap > 0:
            return cap
    except Exception:
        pass
    return 64 * 1024 * 1024   # v7x-sized fallback: safe on every generation


def _pick_batch_tile(b, c, itemsize, vmem_cap):
    """Largest batch tile whose double-buffered inputs plus f32 temporaries
    stay within ~1/4 of physical VMEM (32 MiB on v5e/v6e, 16 MiB on v7x)."""
    stream_budget = vmem_cap // 4
    bytes_per_row = 2 * (c * itemsize + 4)   # 2x double-buffer: logits row + int32 target
    bytes_per_row += 4 * c * 4               # f32 working set: xm, exp, iota, one-hot select
    tb = stream_budget // max(bytes_per_row, 1)
    tb = max(8, (tb // 8) * 8)               # multiple of 8 (sublane granularity), no hard cap
    return b if b <= tb else tb              # single full-batch tile if it fits


def cross_entropy_mean(logits, gt, *, tile_b=None, num_partitions=None):
    """Mean cross-entropy over the batch, computed in a single Pallas kernel."""
    b, c = logits.shape
    vmem_cap = _vmem_capacity_bytes()
    tb = _pick_batch_tile(b, c, logits.dtype.itemsize, vmem_cap) if tile_b is None else tile_b
    assert tb == b or tb % 8 == 0, "batch tile must be a multiple of 8 or the full batch"

    num_tiles = pl.cdiv(b, tb)
    if num_partitions is None:
        num_partitions = 2 if num_tiles >= 2 else 1   # use both TCs on v7x when there is work
    p = max(1, min(num_partitions, num_tiles))
    tpp = pl.cdiv(num_tiles, p)                       # batch tiles per partition

    gt2 = gt.astype(jnp.int32).reshape(b, 1)

    def _in_map(pi, ti):
        # Clamp to the real block range; clamped duplicates are masked in-kernel.
        return (jnp.minimum(pi * tpp + ti, num_tiles - 1), 0)

    out = pl.pallas_call(
        functools.partial(_ce_kernel, total_b=b, tiles_per_part=tpp),
        out_shape=jax.ShapeDtypeStruct((p * 8, 128), jnp.float32),
        grid_spec=pltpu.PrefetchScalarGridSpec(
            num_scalar_prefetch=0,
            grid=(p, tpp),
            in_specs=[
                pl.BlockSpec((tb, c), _in_map),   # logits tile
                pl.BlockSpec((tb, 1), _in_map),   # targets tile
            ],
            # One lane-dense (8,128) partial-output block per partition.
            out_specs=pl.BlockSpec((8, 128), lambda pi, ti: (pi, 0)),
            scratch_shapes=[pltpu.VMEM((tb, 1), jnp.float32)],
        ),
        compiler_params=pltpu.CompilerParams(
            # Partitions are independent (megacore-shardable); the batch-tile
            # axis carries the resident accumulator and stays a reduction.
            dimension_semantics=("parallel", "arbitrary"),
            vmem_limit_bytes=int(min(vmem_cap * 3 // 4, 96 * 1024 * 1024)),
        ),
        cost_estimate=pl.CostEstimate(
            flops=5 * b * c,
            transcendentals=b * c + b,
            bytes_accessed=b * c * logits.dtype.itemsize + 4 * b + p * 8 * 128 * 4,
        ),
    )(logits, gt2)

    # One scalar per partition lives at row p*8, lane 0; finish in plain JAX.
    partials = out[0::8, 0]
    return jnp.sum(partials) * (1.0 / b)


def ce_forward(outputs, gt):
    """Pallas equivalent of ce.forward: (CrossEntropyLoss(outputs[0], gt), 0)."""
    total = cross_entropy_mean(outputs[0], gt)
    return total, 0


def _reference(logits, gt):
    logits = logits.astype(jnp.float32)
    lse = jax.scipy.special.logsumexp(logits, axis=-1)
    return jnp.mean(lse - logits[jnp.arange(logits.shape[0]), gt])


if __name__ == "__main__":
    key = jax.random.PRNGKey(0)
    k1, k2, k3, k4 = jax.random.split(key, 4)

    # Small shapes consistent with the module: batch=8, classes=4.
    B, C = 8, 4
    logits = jax.random.normal(k1, (B, C), dtype=jnp.float32)
    gt = jax.random.randint(k2, (B,), 0, C, dtype=jnp.int32)

    total, aux = ce_forward((logits,), gt)
    total = jax.block_until_ready(total)
    ref = _reference(logits, gt)
    assert jnp.allclose(total, ref, rtol=1e-5, atol=1e-5), (total, ref)
    assert aux == 0

    # Exercise batch tiling, the ragged-last-tile mask, and the 2-partition
    # parallel axis (B=20, tile=8 -> 3 tiles split across 2 partitions).
    B2, C2 = 20, 4
    logits2 = jax.random.normal(k3, (B2, C2), dtype=jnp.float32)
    gt2 = jax.random.randint(k4, (B2,), 0, C2, dtype=jnp.int32)
    total2 = jax.block_until_ready(cross_entropy_mean(logits2, gt2, tile_b=8))
    ref2 = _reference(logits2, gt2)
    assert jnp.allclose(total2, ref2, rtol=1e-5, atol=1e-5), (total2, ref2)

    print("KERNEL_OK")
</pallas_src>

<mosaic_0001>
module attributes {stable_mosaic.version = 11 : i64} {
  func.func @_ce_kernel(%arg0: i32, %arg1: i32, %arg2: memref<8x4xf32, #tpu.memory_space<vmem>>, %arg3: memref<8x1xi32, #tpu.memory_space<vmem>>, %arg4: memref<8x128xf32, #tpu.memory_space<vmem>>, %arg5: memref<8x1xf32, #tpu.memory_space<vmem>>) attributes {dimension_semantics = [#tpu.dimension_semantics<parallel>, #tpu.dimension_semantics<arbitrary>], iteration_bounds = array<i64: 1, 1>, scalar_prefetch = 0 : i64, scratch_operands = 1 : i64, tpu.core_type = #tpu.core_type<tc>, window_params = [{transform_indices = @transform_0, window_bounds = array<i64: 8, 4>}, {transform_indices = @transform_1, window_bounds = array<i64: 8, 1>}, {transform_indices = @transform_2, window_bounds = array<i64: 8, 128>}]} {
    %c0_i32 = arith.constant 0 : i32
    %0 = arith.cmpi eq, %arg1, %c0_i32 : i32
    %1 = arith.extui %0 : i1 to i32
    %c0_i32_0 = arith.constant 0 : i32
    %2 = arith.cmpi ne, %1, %c0_i32_0 : i32
    scf.if %2 {
      %cst_15 = arith.constant 0.000000e+00 : f32
      %37 = vector.broadcast %cst_15 : f32 to vector<8x1xf32>
      %c0_16 = arith.constant 0 : index
      %c0_17 = arith.constant 0 : index
      %38 = vector.load %arg5[%c0_16, %c0_17] : memref<8x1xf32, #tpu.memory_space<vmem>>, vector<8x1xf32>
      tpu.vector_store %arg5[%c0_16, %c0_17], %37 {strides = array<i32>} : memref<8x1xf32, #tpu.memory_space<vmem>>, vector<8x1xf32>,
    } else {
    }
    %c0 = arith.constant 0 : index
    %c0_1 = arith.constant 0 : index
    %3 = vector.load %arg2[%c0, %c0_1] : memref<8x4xf32, #tpu.memory_space<vmem>>, vector<8x4xf32>
    %c0_2 = arith.constant 0 : index
    %c0_3 = arith.constant 0 : index
    %4 = vector.load %arg3[%c0_2, %c0_3] : memref<8x1xi32, #tpu.memory_space<vmem>>, vector<8x1xi32>
    %c1_i32 = arith.constant 1 : i32
    %5 = arith.muli %arg0, %c1_i32 : i32
    %6 = arith.addi %5, %arg1 : i32
    %7 = tpu.iota {dimensions = array<i32: 0>} : vector<8x1xi32>
    %c8_i32 = arith.constant 8 : i32
    %8 = arith.muli %6, %c8_i32 : i32
    %9 = vector.broadcast %8 : i32 to vector<8x1xi32>
    %10 = arith.addi %7, %9 : vector<8x1xi32>
    %c8_i32_4 = arith.constant 8 : i32
    %11 = vector.broadcast %c8_i32_4 : i32 to vector<8x1xi32>
    %12 = arith.cmpi slt, %10, %11 : vector<8x1xi32>
    %cst = arith.constant dense<0xFF800000> : vector<8xf32>
    %13 = vector.multi_reduction <maximumf>, %3, %cst [1] : vector<8x4xf32> to vector<8xf32>
    %14 = vector.shape_cast %13 : vector<8xf32> to vector<8x1xf32>
    %15 = vector.broadcast %14 : vector<8x1xf32> to vector<8x4xf32>
    %16 = arith.subf %3, %15 : vector<8x4xf32>
    %17 = math.exp %16 : vector<8x4xf32>
    %cst_5 = arith.constant dense<0.000000e+00> : vector<8xf32>
    %18 = vector.multi_reduction <add>, %17, %cst_5 [1] : vector<8x4xf32> to vector<8xf32>
    %19 = vector.shape_cast %18 : vector<8xf32> to vector<8x1xf32>
    %20 = math.log %19 : vector<8x1xf32>
    %21 = tpu.iota {dimensions = array<i32: 1>} : vector<8x4xi32>
    %22 = vector.broadcast %4 : vector<8x1xi32> to vector<8x4xi32>
    %23 = arith.cmpi eq, %21, %22 : vector<8x4xi32>
    %cst_6 = arith.constant 0.000000e+00 : f32
    %24 = vector.broadcast %cst_6 : f32 to vector<8x4xf32>
    %25 = arith.select %23, %16, %24 : vector<8x4xi1>, vector<8x4xf32>
    %cst_7 = arith.constant dense<0.000000e+00> : vector<8xf32>
    %26 = vector.multi_reduction <add>, %25, %cst_7 [1] : vector<8x4xf32> to vector<8xf32>
    %27 = vector.shape_cast %26 : vector<8xf32> to vector<8x1xf32>
    %28 = arith.subf %20, %27 : vector<8x1xf32>
    %cst_8 = arith.constant 0.000000e+00 : f32
    %29 = vector.broadcast %cst_8 : f32 to vector<8x1xf32>
    %30 = arith.select %12, %28, %29 : vector<8x1xi1>, vector<8x1xf32>
    %c0_9 = arith.constant 0 : index
    %c0_10 = arith.constant 0 : index
    %31 = vector.load %arg5[%c0_9, %c0_10] : memref<8x1xf32, #tpu.memory_space<vmem>>, vector<8x1xf32>
    %32 = arith.addf %31, %30 : vector<8x1xf32>
    %c0_11 = arith.constant 0 : index
    %c0_12 = arith.constant 0 : index
    %33 = vector.load %arg5[%c0_11, %c0_12] : memref<8x1xf32, #tpu.memory_space<vmem>>, vector<8x1xf32>
    tpu.vector_store %arg5[%c0_11, %c0_12], %32 {strides = array<i32>} : memref<8x1xf32, #tpu.memory_space<vmem>>, vector<8x1xf32>,
    %c0_i32_13 = arith.constant 0 : i32
    %34 = arith.cmpi eq, %arg1, %c0_i32_13 : i32
    %35 = arith.extui %34 : i1 to i32
    %c0_i32_14 = arith.constant 0 : i32
    %36 = arith.cmpi ne, %35, %c0_i32_14 : i32
    scf.if %36 {
      %c0_15 = arith.constant 0 : index
      %c0_16 = arith.constant 0 : index
      %37 = vector.load %arg5[%c0_15, %c0_16] : memref<8x1xf32, #tpu.memory_space<vmem>>, vector<8x1xf32>
      %38 = vector.shape_cast %37 : vector<8x1xf32> to vector<1x8x1xf32>
      %cst_17 = arith.constant dense<0.000000e+00> : vector<1xf32>
      %39 = vector.multi_reduction <add>, %38, %cst_17 [1, 2] : vector<1x8x1xf32> to vector<1xf32>
      %40 = vector.shape_cast %39 : vector<1xf32> to vector<1x1x1xf32>
      %41 = vector.extract %40[0, 0, 0] : f32 from vector<1x1x1xf32>
      %cst_18 = arith.constant 0.000000e+00 : f32
      %42 = vector.broadcast %cst_18 : f32 to vector<8x128xf32>
      %43 = vector.broadcast %41 : f32 to vector<8x128xf32>
      %44 = arith.addf %42, %43 : vector<8x128xf32>
      %c0_19 = arith.constant 0 : index
      %c0_20 = arith.constant 0 : index
      %45 = vector.load %arg4[%c0_19, %c0_20] : memref<8x128xf32, #tpu.memory_space<vmem>>, vector<8x128xf32>
      tpu.vector_store %arg4[%c0_19, %c0_20], %44 {strides = array<i32>} : memref<8x128xf32, #tpu.memory_space<vmem>>, vector<8x128xf32>,
    } else {
    }
    return
  }
  func.func @transform_0(%arg0: i32, %arg1: i32) -> (i32, i32) {
    %c1_i32 = arith.constant 1 : i32
    %0 = arith.muli %arg0, %c1_i32 : i32
    %1 = arith.addi %0, %arg1 : i32
    %c0_i32 = arith.constant 0 : i32
    %2 = arith.minsi %1, %c0_i32 : i32
    %c0_i32_0 = arith.constant 0 : i32
    %c0_i32_1 = arith.constant 0 : i32
    return %2, %c0_i32_0 : i32, i32
  }
  func.func @transform_1(%arg0: i32, %arg1: i32) -> (i32, i32) {
    %c1_i32 = arith.constant 1 : i32
    %0 = arith.muli %arg0, %c1_i32 : i32
    %1 = arith.addi %0, %arg1 : i32
    %c0_i32 = arith.constant 0 : i32
    %2 = arith.minsi %1, %c0_i32 : i32
    %c0_i32_0 = arith.constant 0 : i32
    %c0_i32_1 = arith.constant 0 : i32
    return %2, %c0_i32_0 : i32, i32
  }
  func.func @transform_2(%arg0: i32, %arg1: i32) -> (i32, i32) {
    %c0_i32 = arith.constant 0 : i32
    %c0_i32_0 = arith.constant 0 : i32
    return %arg0, %c0_i32 : i32, i32
  }
}

</mosaic_0001>

<bundles_post_ra>
// kernel: tpu_custom_call.1
= control target key start
LH: loop header
LB: loop body
LE: loop exit
PB: predicated region body
PF: predicated region fallthrough
CT: control target
= control target key end

     0   :  { %vm81_vm0 = vcmask 31744   ;;  %s225_s0 = inlined_call_operand.vmem [shape: f32[8,4], index: 0, kind: input, shape index: {}]   ;;  %s226_s1 = inlined_call_operand.vmem [shape: s32[8,1], index: 1, kind: input, shape index: {}]   ;;  %s227_s2 = inlined_call_operand.hbm [shape: f32[8,128], index: 2, kind: output, shape index: {}]  }
   0x1   :  { %v72_v0 = vld [vmem:[%s225_s0] sm:$0xff] }
   0x2   :  { %7 = vsyncpa [#allocation4], 0  ;;  %v82_v1 = vsel %vm81_vm0, %v72_v0, -inf  ;;  %v186_v2 = vmov 0   ;;  %v73_v3 = vld [vmem:[%s226_s1] sm:$0xff]  ;;  %v93_v7 = vlaneseq  ;;  %vm70_vm2 = vcmask 7168  }
   0x3   :  { %157 = vset.pattern.permute.xlu0 %v186_v2  ;;  %v187_v14 = vmov 0.0   ;;  %s188_s0 = smov [#allocation3]  }
   0x4   :  { %83 = vmax.xlane.f32.xlu0 %v82_v1  ;;  %v94_v8 = vand.u32 127, %v93_v7  ;;  %71 = vst.msk [vmem:[#allocation2] sm:$0xff] %vm70_vm2, %v187_v14  ;;  %s132_s1 = sshll.u32 %s188_s0, 4  ;;  %s133_s1 = int_to_ptr.vmem [resolvable:$true] %s132_s1 }
   0x5   :  { %s162_s14 = scalar_lea.vmem %s133_s1, 128  ;;  %p167_p1 = scmp.lt.s32.totalorder %s133_s1, %s133_s1 }
   0x6   :  { %p163_p0 = scmp.ne.s32.totalorder %s133_s1, %s162_s14  ;;  %p168_p2 = scmp.lt.s32.totalorder %s162_s14, %s162_s14 }
   0x8   :  { %p169_p3 = por %p168_p2, %p167_p1 }
   0xa   :  { %p170_p4 = pnand %p169_p3, %p163_p0 }
   0xb   :  { %v105_v19 = vld [vmem:[#allocation2] sm:$0xff] }
  0x1a   :  { %96 = vperm.xlu0 %157, %v73_v3  }
  0x91   :  { %v84_v4 = vpop.xlane.xlu0 %83 }
  0x92   :  { %v85_v5 = vsub.f32 %v72_v0, %v84_v4 }
  0x94   :  { %v86_v6 = vmul.f32 1.442695, %v85_v5 }
  0x96   :  { %158 = vpow2.f32 %v86_v6 }
  0x99   :  { %v97_v9 = vpop.permute.xlu0 %96 }
  0x9a   :  { %vm98_vm1 = vcmp.eq.s32.totalorder %v94_v8, %v97_v9 }
  0x9b   :  { %v99_v12 = vsel %vm98_vm1, %v85_v5, 0.0 }
  0x9c   :  { %v100_v13 = vsel %vm81_vm0, %v99_v12, 0.0 }
  0xa0   :  { %v159_v10 = vpop.eup %158 }
  0xa1   :  { %v88_v11 = vsel %vm81_vm0, %v159_v10, 0.0 }
  0xa2   :  { %89 = vadd.xlane.f32.xlu1 %v88_v11 }
  0xa6   :  { %101 = vadd.xlane.f32.xlu1 %v100_v13 }
 0x12f   :  { %v90_v15 = vpop.xlane.xlu1 %89 }
 0x130   :  { %160 = vlog2.f32 %v90_v15 }
 0x133   :  { %v102_v18 = vpop.xlane.xlu1 %101 }
 0x13a   :  { %v161_v16 = vpop.eup %160 }
 0x13b   :  { %v92_v17 = vmul.f32 0.6931472, %v161_v16 }
 0x13d   :  { %v103_v20 = vsub.f32 %v92_v17, %v102_v18 }
 0x13f   :  { %v106_v21 = vadd.f32 %v105_v19, %v103_v20 }
 0x141   :  { %108 = vst.msk [vmem:[#allocation2] sm:$0xff] %vm70_vm2, %v106_v21 }
 0x148   :  { %v112_v22 = vld [vmem:[#allocation2] sm:$0xff] }
 0x149   :  { %v113_v23 = vsel %vm70_vm2, %v112_v22, 0.0 }
 0x14a   :  { %114 = vadd.xlane.f32.xlu1 %v113_v23 }
 0x1d7   :  { %v115_v24 = vpop.xlane.xlu1 %114 }
 0x1d8   :  { %v116_v25 = vrot.slane %v115_v24, 4 }
 0x1da   :  { %v117_v26 = vadd.f32 %v116_v25, %v115_v24 }
 0x1dc   :  { %v118_v27 = vrot.slane %v117_v26, 2 }
 0x1de   :  { %v119_v28 = vadd.f32 %v118_v27, %v117_v26 }
 0x1e0   :  { %v120_v29 = vrot.slane %v119_v28, 1 }
 0x1e2   :  { %v121_v30 = vadd.f32 %v120_v29, %v119_v28 }
 0x1e4   :  { %152 = vpush %v121_v30 }
 0x215   :  { %s153_s13 = spop %152 }
 0x216   :  { %v123_v31 = vstv %s153_s13 }
 0x217   :  { %125 = vst [vmem:[#allocation3] sm:$0xff] %v123_v31 }
 0x218   :  { %173 = shalt.err (!%p170_p4)
}
 0x219   :  { %s174_s17 = scalar_lea.hbm %s227_s2, 128 }
 0x21a   :  { %p175_p5 = scmp.ne.s32.totalorder %s227_s2, %s174_s17  ;;  %p178_p6 = scmp.lt.u32.totalorder %s174_s17, %s227_s2 }
 0x21c   :  { %p180_p7 = pnand %p178_p6, %p175_p5 }
 0x21e   :  { %183 = shalt.err (!%p180_p7)
}
 0x21f   :  { %135 = dma.vmem_to_hbm [thread:$0]  %s133_s1, 128, %s227_s2, [#allocation4]  }
 0x220   :  { %184 = dma.done.wait [#allocation4], 128  }
 0x221   :  { %185 = vsyncadd [#allocation4], 4294967168 }
 0x222   :  { %139 = vsyncpa [#allocation4], 1 }

</bundles_post_ra>
